<compile_context>
chip_gen: v6e
topology: v6e:2x2x1
jax: 0.10.0
libtpu: 0.0.40
codegen_flags: <defaults>
</compile_context>

<pallas_src>
import functools

import jax
import jax.numpy as jnp
from jax.experimental import pallas as pl
from jax.experimental.pallas import tpu as pltpu


def _round_up(x: int, m: int) -> int:
    return (x + m - 1) // m * m


def _vmem_budget_and_cap():
    """Returns (usable budget for kernel buffers, VMEM capacity), in bytes."""
    try:
        cap = int(pltpu.get_tpu_info().vmem_capacity_bytes)
    except Exception:
        cap = 64 * 1024 * 1024  # conservative fallback (v7x per-TC VMEM)
    budget = max(24 << 20, min(cap - (16 << 20), int(cap * 0.85)))
    return budget, cap


def _make_scn_linear_kernel(d: int, tile_k: int, acc_in_out: bool):
    def kernel(beta_ref, x_ref, w_ref, b_ref, o_ref, wmix_ref, *maybe_acc):
        # beta_ref: SMEM (d,) f32        scalar-prefetched mixing coefficients
        # x_ref:    VMEM (tM, tK)        activation tile
        # w_ref:    VMEM (d, K_pad, tN)  raw weight copies (single-buffered)
        # b_ref:    VMEM (1, tN) f32     pre-mixed bias row
        # o_ref:    VMEM (tM, tN)        output tile (resident across k)
        # wmix_ref: VMEM (K_pad, tN)     beta-mixed weight cache
        # maybe_acc: ((tM, tN) f32,)     only when o_ref dtype is not f32
        acc_ref = o_ref if acc_in_out else maybe_acc[0]

        m = pl.program_id(1)
        k = pl.program_id(2)
        k0 = pl.multiple_of(k * tile_k, tile_k)

        # configuration(): mix this K-tile of the d weight copies once per
        # out-tile (during the first batch tile's K sweep); all later batch
        # tiles reuse the cache.  d is small & static -> the loop unrolls.
        # NOTE: this cache is why the m grid axis must stay "arbitrary".
        @pl.when(m == 0)
        def _mix():
            w = beta_ref[0] * w_ref[0, pl.ds(k0, tile_k), :].astype(jnp.float32)
            for i in range(1, d):
                w = w + beta_ref[i] * w_ref[i, pl.ds(k0, tile_k), :].astype(
                    jnp.float32
                )
            wmix_ref[pl.ds(k0, tile_k), :] = w.astype(wmix_ref.dtype)

        # Seed the K reduction with the pre-mixed bias row.
        @pl.when(k == 0)
        def _init():
            acc_ref[...] = jnp.broadcast_to(
                b_ref[...].astype(acc_ref.dtype), acc_ref.shape
            )

        # forward(): y = x @ W (+ bias already seeded); MXU, f32 accumulation.
        acc_ref[...] += jnp.dot(
            x_ref[...],
            wmix_ref[pl.ds(k0, tile_k), :],
            preferred_element_type=jnp.float32,
        )

        if not acc_in_out:
            @pl.when(k == pl.num_programs(2) - 1)
            def _finalize():
                o_ref[...] = acc_ref[...].astype(o_ref.dtype)

    return kernel


@functools.partial(jax.jit, static_argnames=("tile_m", "tile_n", "tile_k"))
def scn_linear(x, weight_list, bias_list, beta, *, tile_m=None, tile_n=None,
               tile_k=None):
    """ScnLinear.forward(x) after ScnLinear.configuration(beta).

    x:           (..., in_features)
    weight_list: (d, out_features, in_features)   (stacked nn.Linear weights)
    bias_list:   (d, out_features) or None
    beta:        (d,)
    returns:     (..., out_features), in x.dtype
    """
    d, out_features, in_features = weight_list.shape
    lead = x.shape[:-1]
    x2d = x.reshape(-1, in_features)
    M = x2d.shape[0]

    x_dt = x.dtype
    x_bytes = jnp.dtype(x_dt).itemsize
    o_bytes = x_bytes
    w_bytes = jnp.dtype(weight_list.dtype).itemsize
    sub = max(8, 32 // x_bytes)  # sublane multiple: 8 f32 / 16 bf16 / 32 int8
    acc_in_out = jnp.dtype(x_dt) == jnp.dtype(jnp.float32)

    beta = beta.astype(jnp.float32)

    # configuration() for the bias: d*N scalars -> done once in XLA.
    if bias_list is None:
        b_mixed = jnp.zeros((out_features,), jnp.float32)
    else:
        b_mixed = jnp.einsum("d,do->o", beta, bias_list.astype(jnp.float32))

    # Pre-transpose once so the kernel runs a plain (M,K)@(K,N) contraction.
    w_t = jnp.transpose(weight_list, (0, 2, 1))  # (d, K, N)

    # ---- generation-aware tile selection ------------------------------------
    budget, cap = _vmem_budget_and_cap()
    big_vmem = budget >= (96 << 20)  # v5e / v6e class (128 MiB VMEM)
    if tile_m is None:
        tile_m = 512 if big_vmem else 256
    if tile_n is None:
        tile_n = 256
    if tile_k is None:
        tile_k = 1024 if big_vmem else 512

    tM0 = min(_round_up(tile_m, sub), _round_up(M, sub))
    tN0 = min(tile_n, _round_up(out_features, 128))
    tK0 = min(tile_k, _round_up(in_features, 128))
    # v7x megacore: keep >= 2 n-tiles whenever out_features allows it so the
    # "parallel" n axis has work for both TensorCores.
    if out_features >= 256:
        tN0 = min(tN0, max(128, (_round_up(out_features, 128) // 2) // 128 * 128))

    def footprint(tM, tN, tK, d_eff, wb):
        k_pad = _round_up(in_features, tK)
        return (d_eff * k_pad * tN * wb                  # raw weights, Buffered(1)
                + k_pad * tN * x_bytes                   # wmix cache
                + 2 * tM * tK * x_bytes                  # x tile (double-buffered)
                + 2 * tM * tN * o_bytes                  # out tile (double-buffered)
                + tN * 4                                 # bias row, Buffered(1)
                + (0 if acc_in_out else tM * tN * 4))    # f32 accumulator

    def shrink(tM, tN, tK, d_eff, wb):
        while footprint(tM, tN, tK, d_eff, wb) > budget:
            if tK > 512:
                tK //= 2
            elif tM > 256:
                tM = max(sub, _round_up(tM // 2, sub))
            elif tN > 128:
                tN //= 2
            elif tK > 128:
                tK //= 2
            elif tM > sub:
                tM = max(sub, _round_up(tM // 2, sub))
            else:
                break
        return tM, tN, tK

    d_eff = d
    tM, tN, tK = shrink(tM0, tN0, tK0, d_eff, w_bytes)
    if footprint(tM, tN, tK, d_eff, w_bytes) > budget and d_eff > 1:
        # Huge d * in_features: even tN=128 cannot keep the d-copy full-K raw
        # weight slab resident.  Fall back to pre-mixing W in the wrapper
        # (configuration() runs in XLA; the kernel keeps a single copy).
        w_t = jnp.einsum("d,dkn->kn", beta, w_t.astype(jnp.float32))
        w_t = w_t.astype(x_dt)[None]  # (1, K, N)
        beta = jnp.ones((1,), jnp.float32)
        d_eff = 1
        w_bytes = x_bytes
        tM, tN, tK = shrink(tM0, tN0, tK0, d_eff, w_bytes)

    K_pad = _round_up(in_features, tK)
    N_pad = _round_up(out_features, tN)
    M_pad = _round_up(M, tM)

    x_p = jnp.pad(x2d, ((0, M_pad - M), (0, K_pad - in_features)))
    w_p = jnp.pad(
        w_t, ((0, 0), (0, K_pad - in_features), (0, N_pad - out_features))
    )
    b_p = jnp.pad(b_mixed, (0, N_pad - out_features))[None, :]  # (1, N_pad) f32

    grid = (N_pad // tN, M_pad // tM, K_pad // tK)

    # index_maps receive the scalar-prefetch ref (beta) as a trailing arg.
    x_spec = pl.BlockSpec((tM, tK), lambda n, m, k, beta_ref: (m, k))
    w_spec = pl.BlockSpec(
        (d_eff, K_pad, tN), lambda n, m, k, beta_ref: (0, 0, n),
        pipeline_mode=pl.Buffered(1),   # changes only with n -> single buffer
    )
    b_spec = pl.BlockSpec(
        (1, tN), lambda n, m, k, beta_ref: (0, n),
        pipeline_mode=pl.Buffered(1),
    )
    o_spec = pl.BlockSpec((tM, tN), lambda n, m, k, beta_ref: (m, n))

    scratch = [pltpu.VMEM((K_pad, tN), x_dt)]  # beta-mixed weight cache
    if not acc_in_out:
        scratch.append(pltpu.VMEM((tM, tN), jnp.float32))

    fp = footprint(tM, tN, tK, d_eff, w_bytes)
    vmem_limit = int(min(cap - (2 << 20),
                         max(32 << 20, int(fp * 1.3) + (4 << 20))))

    cost = pl.CostEstimate(
        flops=2 * M * in_features * out_features
        + 2 * d_eff * in_features * out_features,
        transcendentals=0,
        bytes_accessed=(d_eff * in_features * out_features * w_bytes
                        + M * in_features * x_bytes
                        + M * out_features * o_bytes
                        + out_features * 4),
    )

    out2d = pl.pallas_call(
        _make_scn_linear_kernel(d_eff, tK, acc_in_out),
        out_shape=jax.ShapeDtypeStruct((M_pad, N_pad), x_dt),
        grid_spec=pltpu.PrefetchScalarGridSpec(
            num_scalar_prefetch=1,
            grid=grid,
            in_specs=[x_spec, w_spec, b_spec],
            out_specs=o_spec,
            scratch_shapes=scratch,
        ),
        compiler_params=pltpu.CompilerParams(
            # n is safe to core-shard; m must stay "arbitrary" because of the
            # m == 0 wmix cache; k is the reduction.
            dimension_semantics=("parallel", "arbitrary", "arbitrary"),
            vmem_limit_bytes=vmem_limit,
        ),
        cost_estimate=cost,
    )(beta, x_p, w_p, b_p)

    return out2d[:M, :out_features].reshape(*lead, out_features)


if __name__ == "__main__":
    key = jax.random.PRNGKey(0)
    k_x, k_w, k_b, k_beta = jax.random.split(key, 4)

    # Small shapes consistent with ScnLinear(in_features=32, out_features=32, d=3)
    d = 3
    in_features = 32
    out_features = 32
    batch, seq = 2, 8

    x = jax.random.normal(k_x, (batch, seq, in_features), dtype=jnp.float32)
    weight_list = 0.1 * jax.random.normal(
        k_w, (d, out_features, in_features), dtype=jnp.float32
    )
    bias_list = 0.1 * jax.random.normal(k_b, (d, out_features), dtype=jnp.float32)
    beta = jax.random.uniform(k_beta, (d,), dtype=jnp.float32)

    y = scn_linear(x, weight_list, bias_list, beta)
    y = jax.block_until_ready(y)

    # Pure-JAX reference (== PyTorch configuration() + F.linear()).
    w_ref = jnp.einsum("d,doi->oi", beta, weight_list)
    b_ref = jnp.einsum("d,do->o", beta, bias_list)
    y_ref = jnp.einsum("bsi,oi->bso", x, w_ref) + b_ref

    assert y.shape == (batch, seq, out_features)
    assert jnp.allclose(y, y_ref, atol=1e-4, rtol=1e-4), "mismatch vs reference"

    print("KERNEL_OK")
</pallas_src>

<mosaic_0001>
module attributes {stable_mosaic.version = 11 : i64} {
  func.func @kernel(%arg0: i32, %arg1: i32, %arg2: i32, %arg3: memref<3xf32, #tpu.memory_space<smem>>, %arg4: memref<16x128xf32, #tpu.memory_space<vmem>>, %arg5: memref<3x128x128xf32, #tpu.memory_space<vmem>>, %arg6: memref<1x128xf32, #tpu.memory_space<vmem>>, %arg7: memref<16x128xf32, #tpu.memory_space<vmem>>, %arg8: memref<128x128xf32, #tpu.memory_space<vmem>>) attributes {dimension_semantics = [#tpu.dimension_semantics<parallel>, #tpu.dimension_semantics<arbitrary>, #tpu.dimension_semantics<arbitrary>], iteration_bounds = array<i64: 1, 1, 1>, scalar_prefetch = 1 : i64, scratch_operands = 1 : i64, tpu.core_type = #tpu.core_type<tc>, window_params = [{transform_indices = @transform_0, window_bounds = array<i64: 16, 128>}, {pipeline_mode = #tpu.pipeline_mode<synchronous>, transform_indices = @transform_1, window_bounds = array<i64: 3, 128, 128>}, {pipeline_mode = #tpu.pipeline_mode<synchronous>, transform_indices = @transform_2, window_bounds = array<i64: 1, 128>}, {transform_indices = @transform_3, window_bounds = array<i64: 16, 128>}]} {
    %c128_i32 = arith.constant 128 : i32
    %0 = arith.muli %arg2, %c128_i32 : i32
    %1 = tpu.assume_multiple %0, 128 : i32
    %c0_i32 = arith.constant 0 : i32
    %2 = arith.cmpi eq, %arg1, %c0_i32 : i32
    %3 = arith.extui %2 : i1 to i32
    %c0_i32_0 = arith.constant 0 : i32
    %4 = arith.cmpi ne, %3, %c0_i32_0 : i32
    scf.if %4 {
      %c0_9 = arith.constant 0 : index
      %15 = memref.load %arg3[%c0_9] : memref<3xf32, #tpu.memory_space<smem>>
      %c0_10 = arith.constant 0 : index
      %16 = arith.index_cast %1 : i32 to index
      %c0_11 = arith.constant 0 : index
      %17 = vector.load %arg5[%c0_10, %16, %c0_11] : memref<3x128x128xf32, #tpu.memory_space<vmem>>, vector<1x128x128xf32>
      %18 = vector.shape_cast %17 : vector<1x128x128xf32> to vector<128x128xf32>
      %19 = vector.broadcast %15 : f32 to vector<128x128xf32>
      %20 = arith.mulf %19, %18 : vector<128x128xf32>
      %c1 = arith.constant 1 : index
      %21 = memref.load %arg3[%c1] : memref<3xf32, #tpu.memory_space<smem>>
      %c1_12 = arith.constant 1 : index
      %22 = arith.index_cast %1 : i32 to index
      %c0_13 = arith.constant 0 : index
      %23 = vector.load %arg5[%c1_12, %22, %c0_13] : memref<3x128x128xf32, #tpu.memory_space<vmem>>, vector<1x128x128xf32>
      %24 = vector.shape_cast %23 : vector<1x128x128xf32> to vector<128x128xf32>
      %25 = vector.broadcast %21 : f32 to vector<128x128xf32>
      %26 = arith.mulf %25, %24 : vector<128x128xf32>
      %27 = arith.addf %20, %26 : vector<128x128xf32>
      %c2 = arith.constant 2 : index
      %28 = memref.load %arg3[%c2] : memref<3xf32, #tpu.memory_space<smem>>
      %c2_14 = arith.constant 2 : index
      %29 = arith.index_cast %1 : i32 to index
      %c0_15 = arith.constant 0 : index
      %30 = vector.load %arg5[%c2_14, %29, %c0_15] : memref<3x128x128xf32, #tpu.memory_space<vmem>>, vector<1x128x128xf32>
      %31 = vector.shape_cast %30 : vector<1x128x128xf32> to vector<128x128xf32>
      %32 = vector.broadcast %28 : f32 to vector<128x128xf32>
      %33 = arith.mulf %32, %31 : vector<128x128xf32>
      %34 = arith.addf %27, %33 : vector<128x128xf32>
      %35 = arith.index_cast %1 : i32 to index
      %c0_16 = arith.constant 0 : index
      %36 = vector.load %arg8[%35, %c0_16] : memref<128x128xf32, #tpu.memory_space<vmem>>, vector<128x128xf32>
      tpu.vector_store %arg8[%35, %c0_16], %34 {strides = array<i32>} : memref<128x128xf32, #tpu.memory_space<vmem>>, vector<128x128xf32>,
    } else {
    }
    %c0_i32_1 = arith.constant 0 : i32
    %5 = arith.cmpi eq, %arg2, %c0_i32_1 : i32
    %6 = arith.extui %5 : i1 to i32
    %c0_i32_2 = arith.constant 0 : i32
    %7 = arith.cmpi ne, %6, %c0_i32_2 : i32
    scf.if %7 {
      %c0_9 = arith.constant 0 : index
      %c0_10 = arith.constant 0 : index
      %15 = vector.load %arg6[%c0_9, %c0_10] : memref<1x128xf32, #tpu.memory_space<vmem>>, vector<1x128xf32>
      %16 = vector.shape_cast %15 : vector<1x128xf32> to vector<1x128xf32>
      %17 = vector.broadcast %16 : vector<1x128xf32> to vector<16x128xf32>
      %c0_11 = arith.constant 0 : index
      %c0_12 = arith.constant 0 : index
      %18 = vector.load %arg7[%c0_11, %c0_12] : memref<16x128xf32, #tpu.memory_space<vmem>>, vector<16x128xf32>
      tpu.vector_store %arg7[%c0_11, %c0_12], %17 {strides = array<i32>} : memref<16x128xf32, #tpu.memory_space<vmem>>, vector<16x128xf32>,
    } else {
    }
    %c0 = arith.constant 0 : index
    %c0_3 = arith.constant 0 : index
    %8 = vector.load %arg7[%c0, %c0_3] : memref<16x128xf32, #tpu.memory_space<vmem>>, vector<16x128xf32>
    %c0_4 = arith.constant 0 : index
    %c0_5 = arith.constant 0 : index
    %9 = vector.load %arg4[%c0_4, %c0_5] : memref<16x128xf32, #tpu.memory_space<vmem>>, vector<16x128xf32>
    %10 = arith.index_cast %1 : i32 to index
    %c0_6 = arith.constant 0 : index
    %11 = vector.load %arg8[%10, %c0_6] : memref<128x128xf32, #tpu.memory_space<vmem>>, vector<128x128xf32>
    %cst = arith.constant dense<0.000000e+00> : vector<16x128xf32>
    %12 = tpu.matmul %9, %11, %cst {dimension_numbers = #tpu.dot_dimension_numbers<[1], [0], [0], [1], [0, 0, 1, 1], [], []>} : vector<16x128xf32>, vector<128x128xf32>, vector<16x128xf32> -> vector<16x128xf32>
    %13 = arith.addf %8, %12 : vector<16x128xf32>
    %c0_7 = arith.constant 0 : index
    %c0_8 = arith.constant 0 : index
    %14 = vector.load %arg7[%c0_7, %c0_8] : memref<16x128xf32, #tpu.memory_space<vmem>>, vector<16x128xf32>
    tpu.vector_store %arg7[%c0_7, %c0_8], %13 {strides = array<i32>} : memref<16x128xf32, #tpu.memory_space<vmem>>, vector<16x128xf32>,
    return
  }
  func.func @transform_0(%arg0: i32, %arg1: i32, %arg2: i32, %arg3: memref<3xf32, #tpu.memory_space<smem>>) -> (i32, i32) {
    %c0_i32 = arith.constant 0 : i32
    return %arg1, %arg2 : i32, i32
  }
  func.func @transform_1(%arg0: i32, %arg1: i32, %arg2: i32, %arg3: memref<3xf32, #tpu.memory_space<smem>>) -> (i32, i32, i32) {
    %c0_i32 = arith.constant 0 : i32
    %c0_i32_0 = arith.constant 0 : i32
    %c0_i32_1 = arith.constant 0 : i32
    return %c0_i32, %c0_i32_0, %arg0 : i32, i32, i32
  }
  func.func @transform_2(%arg0: i32, %arg1: i32, %arg2: i32, %arg3: memref<3xf32, #tpu.memory_space<smem>>) -> (i32, i32) {
    %c0_i32 = arith.constant 0 : i32
    %c0_i32_0 = arith.constant 0 : i32
    return %c0_i32, %arg0 : i32, i32
  }
  func.func @transform_3(%arg0: i32, %arg1: i32, %arg2: i32, %arg3: memref<3xf32, #tpu.memory_space<smem>>) -> (i32, i32) {
    %c0_i32 = arith.constant 0 : i32
    return %arg1, %arg0 : i32, i32
  }
}

</mosaic_0001>

<bundles_post_ra>
// kernel: scn_linear.1
= control target key start
LH: loop header
LB: loop body
LE: loop exit
PB: predicated region body
PF: predicated region fallthrough
CT: control target
= control target key end

     0   :  { %s646_s0 = inlined_call_operand.vmem [shape: f32[3], index: 0, kind: input, shape index: {}]   ;;  %s647_s1 = inlined_call_operand.vmem [shape: f32[16,128], index: 1, kind: input, shape index: {}]   ;;  %s648_s2 = inlined_call_operand.vmem [shape: f32[3,128,128], index: 2, kind: input, shape index: {}]   ;;  %s649_s3 = inlined_call_operand.vmem [shape: f32[1,128], index: 3, kind: input, shape index: {}]   ;;  %s650_s4 = inlined_call_operand.vmem [shape: f32[16,128], index: 4, kind: output, shape index: {}]  }
   0x1   :  { %s9_s17 = sshll.u32 %s646_s0, 4  ;;  %s10_s17 = int_to_ptr.vmem [resolvable:$true] %s9_s17 }
   0x2   :  { %s390_s18 = scalar_lea.vmem %s10_s17, 16  ;;  %p395_p1 = scmp.lt.s32.totalorder %s10_s17, %s10_s17 }
   0x3   :  { %p391_p0 = scmp.ne.s32.totalorder %s10_s17, %s390_s18  ;;  %p396_p2 = scmp.lt.s32.totalorder %s390_s18, %s390_s18 }
   0x5   :  { %p397_p3 = por %p396_p2, %p395_p1 }
   0x7   :  { %p398_p4 = pnand %p397_p3, %p391_p0 }
   0x9   :  { %401 = shalt.err (!%p398_p4)  }
   0xa   :  { %s404_s19 = smov [#allocation4]  }
   0xb   :  { %12 = dma.vmem_to_smem %s10_s17, 16, %s404_s19, [#allocation3] }
   0xc   :  { %402 = dma.done.wait [#allocation3], 16 }
   0xd   :  { %403 = vsyncadd [#allocation3], 4294967280 }
   0xe   :  { %14 = sfence }
   0xf   :  { %s26_s20 = sld [smem:[#allocation4]]  ;;  %v43_v0 = vld [vmem:[%s648_s2 + $0x78] sm:$0xff]  ;;  %v42_v2 = vld [vmem:[%s648_s2 + $0x70] sm:$0xff]  ;;  %v41_v3 = vld [vmem:[%s648_s2 + $0x68] sm:$0xff] }
  0x10   :  { %s301_s21 = sld [smem:[#allocation4 + $0x1]]  ;;  %v317_v1 = vld [vmem:[%s648_s2 + $0xf8] sm:$0xff]  ;;  %v316_v5 = vld [vmem:[%s648_s2 + $0xf0] sm:$0xff]  ;;  %v315_v6 = vld [vmem:[%s648_s2 + $0xe8] sm:$0xff] }
  0x11   :  { %s318_s22 = sld [smem:[#allocation4 + $0x2]]  ;;  %v334_v4 = vld [vmem:[%s648_s2 + $0x178] sm:$0xff]  ;;  %v333_v8 = vld [vmem:[%s648_s2 + $0x170] sm:$0xff]  ;;  %v332_v9 = vld [vmem:[%s648_s2 + $0x168] sm:$0xff] }
  0x12   :  { %v40_v10 = vld [vmem:[%s648_s2 + $0x60] sm:$0xff]  ;;  %v39_v20 = vld [vmem:[%s648_s2 + $0x58] sm:$0xff]  ;;  %v38_v32 = vld [vmem:[%s648_s2 + $0x50] sm:$0xff] }
  0x13   :  { %v314_v15 = vld [vmem:[%s648_s2 + $0xe0] sm:$0xff]  ;;  %v313_v21 = vld [vmem:[%s648_s2 + $0xd8] sm:$0xff]  ;;  %v312_v33 = vld [vmem:[%s648_s2 + $0xd0] sm:$0xff] }
  0x14   :  { %v331_v26 = vld [vmem:[%s648_s2 + $0x160] sm:$0xff]  ;;  %v330_v31 = vld [vmem:[%s648_s2 + $0x158] sm:$0xff]  ;;  %v37_v36 = vld [vmem:[%s648_s2 + $0x48] sm:$0xff] }
  0x15   :  { %v454_v7 = vstv %s26_s20  ;;  %v311_v37 = vld [vmem:[%s648_s2 + $0xc8] sm:$0xff]  ;;  %v329_v42 = vld [vmem:[%s648_s2 + $0x150] sm:$0xff]  ;;  %v36_v46 = vld [vmem:[%s648_s2 + $0x40] sm:$0xff] }
  0x16   :  { %v60_v11 = vmul.f32 %v454_v7, %v43_v0  ;;  %v466_v12 = vstv %s301_s21  ;;  %v59_v13 = vmul.f32 %v454_v7, %v42_v2  ;;  %v58_v14 = vmul.f32 %v454_v7, %v41_v3  ;;  %v310_v47 = vld [vmem:[%s648_s2 + $0xc0] sm:$0xff]  ;;  %v35_v52 = vld [vmem:[%s648_s2 + $0x38] sm:$0xff]  ;;  %v328_v55 = vld [vmem:[%s648_s2 + $0x148] sm:$0xff] }
  0x17   :  { %v96_v16 = vmul.f32 %v317_v1, %v466_v12  ;;  %v474_v17 = vstv %s318_s22  ;;  %v95_v18 = vmul.f32 %v316_v5, %v466_v12  ;;  %v94_v19 = vmul.f32 %v315_v6, %v466_v12  ;;  %v309_v53 = vld [vmem:[%s648_s2 + $0xb8] sm:$0xff]  ;;  %v327_v60 = vld [vmem:[%s648_s2 + $0x140] sm:$0xff]  ;;  %v34_v63 = vld [vmem:[%s648_s2 + $0x30] sm:$0xff] }
  0x18   :  { %v148_v22 = vmul.f32 %v334_v4, %v474_v17  ;;  %v147_v23 = vmul.f32 %v333_v8, %v474_v17  ;;  %v146_v24 = vmul.f32 %v332_v9, %v474_v17  ;;  %v57_v25 = vmul.f32 %v454_v7, %v40_v10  ;;  %v308_v0 = vld [vmem:[%s648_s2 + $0xb0] sm:$0xff]  ;;  %v326_v4 = vld [vmem:[%s648_s2 + $0x138] sm:$0xff]  ;;  %v33_v6 = vld [vmem:[%s648_s2 + $0x28] sm:$0xff] }
  0x19   :  { %v112_v27 = vadd.f32 %v96_v16, %v60_v11  ;;  %v111_v28 = vadd.f32 %v95_v18, %v59_v13  ;;  %v110_v29 = vadd.f32 %v94_v19, %v58_v14  ;;  %v93_v30 = vmul.f32 %v314_v15, %v466_v12  ;;  %v307_v8 = vld [vmem:[%s648_s2 + $0xa8] sm:$0xff]  ;;  %v325_v14 = vld [vmem:[%s648_s2 + $0x130] sm:$0xff]  ;;  %v32_v18 = vld [vmem:[%s648_s2 + $0x20] sm:$0xff] }
  0x1a   :  { %v56_v34 = vmul.f32 %v454_v7, %v39_v20  ;;  %v92_v35 = vmul.f32 %v313_v21, %v466_v12  ;;  %v145_v41 = vmul.f32 %v331_v26, %v474_v17  ;;  %v144_v43 = vmul.f32 %v330_v31, %v474_v17  ;;  %v306_v19 = vld [vmem:[%s648_s2 + $0xa0] sm:$0xff]  ;;  %v305_v26 = vld [vmem:[%s648_s2 + $0x98] sm:$0xff] }
  0x1b   :  { %v164_v38 = vadd.f32 %v148_v22, %v112_v27  ;;  %v163_v39 = vadd.f32 %v147_v23, %v111_v28  ;;  %v109_v40 = vadd.f32 %v93_v30, %v57_v25  ;;  %v55_v44 = vmul.f32 %v454_v7, %v38_v32  ;;  %v324_v23 = vld [vmem:[%s648_s2 + $0x128] sm:$0xff]  ;;  %v31_v25 = vld [vmem:[%s648_s2 + $0x18] sm:$0xff]  ;;  %v197_v27 = vld [vmem:[%s647_s1] sm:$0xff] }
  0x1c   :  { %v91_v45 = vmul.f32 %v312_v33, %v466_v12  ;;  %v162_v48 = vadd.f32 %v146_v24, %v110_v29  ;;  %v108_v49 = vadd.f32 %v92_v35, %v56_v34  ;;  %v54_v50 = vmul.f32 %v454_v7, %v37_v36  ;;  %v323_v32 = vld [vmem:[%s648_s2 + $0x120] sm:$0xff]  ;;  %v30_v35 = vld [vmem:[%s648_s2 + $0x10] sm:$0xff]  ;;  %386 = vmatprep.mubr.f32.mxu0 %v197_v27 }
  0x1d   :  { %354 = vmatprep.subr.mxu0 %v164_v38  ;;  %v90_v51 = vmul.f32 %v311_v37, %v466_v12  ;;  %v143_v54 = vmul.f32 %v329_v42, %v474_v17  ;;  %v161_v56 = vadd.f32 %v145_v41, %v109_v40  ;;  %v53_v58 = vmul.f32 %v454_v7, %v36_v46  ;;  %v304_v36 = vld [vmem:[%s648_s2 + $0x90] sm:$0xff]  ;;  %v322_v40 = vld [vmem:[%s648_s2 + $0x118] sm:$0xff]  ;;  %v29_v42 = vld [vmem:[%s648_s2 + $0x8] sm:$0xff] }
  0x1e   :  { %355 = vmatpush3.msra.mxu0 %v164_v38  ;;  %v107_v57 = vadd.f32 %v91_v45, %v55_v44  ;;  %v89_v59 = vmul.f32 %v310_v47, %v466_v12  ;;  %v52_v61 = vmul.f32 %v454_v7, %v35_v52  ;;  %v88_v62 = vmul.f32 %v309_v53, %v466_v12 }
  0x1f   :  { %356 = vmatprep.subr.mxu0 %v163_v39  ;;  %v160_v1 = vadd.f32 %v144_v43, %v108_v49  ;;  %v106_v2 = vadd.f32 %v90_v51, %v54_v50  ;;  %v142_v3 = vmul.f32 %v328_v55, %v474_v17  ;;  %v141_v5 = vmul.f32 %v327_v60, %v474_v17  ;;  %v303_v43 = vld [vmem:[%s648_s2 + $0x88] sm:$0xff]  ;;  %v28_v50 = vld [vmem:[%s648_s2] sm:$0xff] }
  0x20   :  { %357 = vmatpush3.msra.mxu0 %v163_v39  ;;  %v159_v9 = vadd.f32 %v143_v54, %v107_v57  ;;  %v105_v10 = vadd.f32 %v89_v59, %v53_v58  ;;  %v51_v11 = vmul.f32 %v454_v7, %v34_v63  ;;  %v87_v13 = vmul.f32 %v308_v0, %v466_v12  ;;  %v302_v51 = vld [vmem:[%s648_s2 + $0x80] sm:$0xff]  ;;  %v320_v57 = vld [vmem:[%s648_s2 + $0x108] sm:$0xff] }
  0x21   :  { %358 = vmatprep.subr.mxu0 %v162_v48  ;;  %v104_v15 = vadd.f32 %v88_v62, %v52_v61  ;;  %v140_v16 = vmul.f32 %v326_v4, %v474_v17  ;;  %v158_v20 = vadd.f32 %v142_v3, %v106_v2  ;;  %v50_v21 = vmul.f32 %v454_v7, %v33_v6  ;;  %v319_v62 = vld [vmem:[%s648_s2 + $0x100] sm:$0xff] }
  0x22   :  { %359 = vmatpush3.msra.mxu0 %v162_v48  ;;  %v86_v22 = vmul.f32 %v307_v8, %v466_v12  ;;  %v139_v24 = vmul.f32 %v325_v14, %v474_v17  ;;  %v157_v28 = vadd.f32 %v141_v5, %v105_v10  ;;  %v103_v29 = vadd.f32 %v87_v13, %v51_v11  ;;  %v321_v48 = vld [vmem:[%s648_s2 + $0x110] sm:$0xff]  ;;  %v198_v5 = vld [vmem:[%s647_s1 + $0x8] sm:$0xff] }
  0x23   :  { %360 = vmatprep.subr.mxu0 %v161_v56  ;;  %v49_v30 = vmul.f32 %v454_v7, %v32_v18  ;;  %v85_v31 = vmul.f32 %v306_v19, %v466_v12  ;;  %v156_v33 = vadd.f32 %v140_v16, %v104_v15  ;;  %v138_v34 = vmul.f32 %v324_v23, %v474_v17 }
  0x24   :  { %361 = vmatpush3.msra.mxu0 %v161_v56  ;;  %v102_v37 = vadd.f32 %v86_v22, %v50_v21  ;;  %v48_v38 = vmul.f32 %v454_v7, %v31_v25  ;;  %v84_v39 = vmul.f32 %v305_v26, %v466_v12  ;;  %v137_v41 = vmul.f32 %v323_v32, %v474_v17 }
  0x25   :  { %362 = vmatprep.subr.mxu0 %v160_v1  ;;  %v155_v44 = vadd.f32 %v139_v24, %v103_v29  ;;  %v101_v45 = vadd.f32 %v85_v31, %v49_v30  ;;  %v47_v46 = vmul.f32 %v454_v7, %v30_v35  ;;  %v83_v47 = vmul.f32 %v304_v36, %v466_v12 }
  0x26   :  { %363 = vmatpush3.msra.mxu0 %v160_v1  ;;  %v136_v49 = vmul.f32 %v322_v40, %v474_v17  ;;  %v154_v52 = vadd.f32 %v138_v34, %v102_v37  ;;  %v100_v53 = vadd.f32 %v84_v39, %v48_v38  ;;  %v46_v54 = vmul.f32 %v454_v7, %v29_v42 }
  0x27   :  { %364 = vmatprep.subr.mxu0 %v159_v9  ;;  %v82_v55 = vmul.f32 %v303_v43, %v466_v12  ;;  %v135_v56 = vmul.f32 %v321_v48, %v474_v17  ;;  %v153_v58 = vadd.f32 %v137_v41, %v101_v45  ;;  %v99_v59 = vadd.f32 %v83_v47, %v47_v46 }
  0x28   :  { %365 = vmatpush3.msra.mxu0 %v159_v9  ;;  %v45_v60 = vmul.f32 %v454_v7, %v28_v50  ;;  %v81_v61 = vmul.f32 %v302_v51, %v466_v12  ;;  %v152_v63 = vadd.f32 %v136_v49, %v100_v53  ;;  %v134_v1 = vmul.f32 %v320_v57, %v474_v17 }
  0x29   :  { %366 = vmatprep.subr.mxu0 %v158_v20  ;;  %v98_v0 = vadd.f32 %v82_v55, %v46_v54  ;;  %v151_v2 = vadd.f32 %v135_v56, %v99_v59  ;;  %v133_v4 = vmul.f32 %v319_v62, %v474_v17  ;;  %v335_v17 = vld [vmem:[%s649_s3] ss:$0 sm:$0xff] }
  0x2a   :  { %367 = vmatpush3.msra.mxu0 %v158_v20  ;;  %v97_v3 = vadd.f32 %v81_v61, %v45_v60 }
  0x2b   :  { %368 = vmatprep.subr.mxu0 %v157_v28  ;;  %v150_v7 = vadd.f32 %v134_v1, %v98_v0 }
  0x2c   :  { %369 = vmatpush3.msra.mxu0 %v157_v28  ;;  %v149_v12 = vadd.f32 %v133_v4, %v97_v3 }
  0x2d   :  { %370 = vmatprep.subr.mxu0 %v156_v33 }
  0x2e   :  { %371 = vmatpush3.msra.mxu0 %v156_v33 }
  0x2f   :  { %372 = vmatprep.subr.mxu0 %v155_v44 }
  0x30   :  { %373 = vmatpush3.msra.mxu0 %v155_v44 }
  0x31   :  { %374 = vmatprep.subr.mxu0 %v154_v52 }
  0x32   :  { %375 = vmatpush3.msra.mxu0 %v154_v52 }
  0x33   :  { %376 = vmatprep.subr.mxu0 %v153_v58 }
  0x34   :  { %377 = vmatpush3.msra.mxu0 %v153_v58 }
  0x35   :  { %378 = vmatprep.subr.mxu0 %v152_v63 }
  0x36   :  { %379 = vmatpush3.msra.mxu0 %v152_v63 }
  0x37   :  { %380 = vmatprep.subr.mxu0 %v151_v2 }
  0x38   :  { %381 = vmatpush3.msra.mxu0 %v151_v2 }
  0x39   :  { %382 = vmatprep.subr.mxu0 %v150_v7 }
  0x3a   :  { %383 = vmatpush3.msra.mxu0 %v150_v7 }
  0x3b   :  { %384 = vmatprep.subr.mxu0 %v149_v12 }
  0x3c   :  { %385 = vmatpush3.msra.mxu0 %v149_v12 }
  0x3d   :  { %387 = vmatmul.mubr.f32.vlgmr.msra.gmra.mxu0 %v198_v5 }
  0xfd   :  { %v388_v6 = vpop.f32.mrf.mxu0 }
  0xfe   :  { %v292_v8 = vadd.f32 %v388_v6, %v335_v17 }
  0xff   :  { %v282_v9 = vpop.f32.mrf.mxu0 }
 0x100   :  { %294 = vst [vmem:[%s650_s4 + $0x8] sm:$0xff] %v292_v8  ;;  %v291_v10 = vadd.f32 %v335_v17, %v282_v9 }
 0x102   :  { %293 = vst [vmem:[%s650_s4] sm:$0xff] %v291_v10 }

</bundles_post_ra>
